<compile_context>
chip_gen: v6e
topology: v6e:2x2x1
jax: 0.10.0
libtpu: 0.0.40
codegen_flags: <defaults>
</compile_context>

<pallas_src>
import functools

import numpy as np
import jax
import jax.numpy as jnp
from jax.experimental import pallas as pl
from jax.experimental.pallas import tpu as pltpu


@functools.lru_cache(maxsize=32)
def _interp_matrix_np(t_in, t_out):
    """numpy M (t_in, t_out) s.t. y @ M == F.interpolate(y, t_out, 'linear',
    align_corners=False).  Built once per (t_in, t_out) on host."""
    j = np.arange(t_out, dtype=np.float32)
    src = (j + 0.5) * np.float32(t_in / t_out) - 0.5    # align_corners=False
    src = np.maximum(src, 0.0)                          # PyTorch clamps negatives to 0
    i0 = np.clip(np.floor(src).astype(np.int64), 0, t_in - 1)
    i1 = np.minimum(i0 + 1, t_in - 1)
    w1 = (src - i0).astype(np.float32)
    w0 = np.float32(1.0) - w1
    m = np.zeros((t_in, t_out), np.float32)
    cols = np.arange(t_out)
    np.add.at(m, (i0, cols), w0)
    np.add.at(m, (i1, cols), w1)
    return m


def _mcc1d_kernel(
    x_ref,     # (1, C_in, tT)        input tile (original dtype)
    c_ref,     # (1, C_cond+1, Tc)    condition (+ ones row for folded biases), f32
    m_ref,     # (Tc, tT)             interp-matrix tile (bf16 by default)
    wsf_ref,   # (2*C_in, C_cond+1)   [w_scale; w_shift | b_scale; b_shift], f32
    wc_ref,    # (C_out, K*C_in)      tap-major flattened causal-conv weight
    bc_ref,    # (C_out, 1)           causal-conv bias (f32)
    o_ref,     # (1, C_out, tT)
    pre_ref,   # VMEM (B, 2*C_in, Tc) f32: per-batch pre-interp scale/shift
    halo_ref,  # VMEM (B, C_in, max(pad,1)) f32: per-batch causal left context
    *,
    c_in,
    kernel_size,
    dilation,
):
    t = pl.program_id(0)          # time tile (outer)
    b = pl.program_id(1)          # batch     (inner)
    pad = (kernel_size - 1) * dilation

    x = x_ref[0].astype(jnp.float32)      # (C_in, tT) — modulation stays f32 on the VPU
    t_tile = x.shape[1]

    # Batch-only work hoisted out of the time loop: fused 1x1 convs (scale &
    # shift stacked, biases folded via the ones row of c) computed once per
    # batch element on its first time tile; causal halo zeroed at the same time.
    @pl.when(t == 0)
    def _():
        pre_ref[b] = jnp.dot(wsf_ref[...], c_ref[0],
                             preferred_element_type=jnp.float32)          # (2C_in, Tc)
        if pad > 0:
            halo_ref[b] = jnp.zeros(
                (halo_ref.shape[1], halo_ref.shape[2]), jnp.float32)

    pre = pre_ref[b]                                                      # (2C_in, Tc) f32

    # Single interp matmul for both scale and shift (bf16 operands, f32 accumulate).
    ss = jnp.dot(pre.astype(m_ref.dtype), m_ref[...],
                 preferred_element_type=jnp.float32)                      # (2C_in, tT)
    scale = ss[:c_in]
    shift = ss[c_in:]

    xm = x * scale + shift                                                # (C_in, tT) f32

    # Causal left context: zeros on the first time tile of each batch element,
    # otherwise the last `pad` modulated columns carried from the previous tile.
    if pad > 0:
        xp = jnp.concatenate([halo_ref[b], xm], axis=1)                   # (C_in, pad+tT)
        if t_tile >= pad:
            halo_ref[b] = xm[:, t_tile - pad:]
    else:
        xp = xm

    if c_in >= 128:
        # Large channel counts: K accumulating per-tap matmuls — each tap already
        # fills the MXU, and this avoids the (K*C_in, tT) stack/concat relayouts.
        c_out = wc_ref.shape[0]
        acc = jnp.zeros((c_out, t_tile), jnp.float32)
        for k in range(kernel_size):
            tap = xp[:, k * dilation: k * dilation + t_tile]
            wk = wc_ref[:, k * c_in:(k + 1) * c_in]
            acc = acc + jnp.dot(wk, tap.astype(wc_ref.dtype),
                                preferred_element_type=jnp.float32)
        out = acc + bc_ref[...]
    else:
        # Small channels: stack the K shifted views so the contraction dim is
        # K*C_in instead of K tiny matmuls.
        taps = [xp[:, k * dilation: k * dilation + t_tile] for k in range(kernel_size)]
        stacked = jnp.concatenate(taps, axis=0) if kernel_size > 1 else taps[0]
        out = jnp.dot(wc_ref[...], stacked.astype(wc_ref.dtype),
                      preferred_element_type=jnp.float32) + bc_ref[...]

    o_ref[0] = out.astype(o_ref.dtype)


def _choose_time_tile(T, pad, bytes_per_col, max_tile=2048, budget=32 << 20):
    """Largest legal time tile: T itself, or a multiple of 128 dividing T that
    is >= pad, <= max_tile, and keeps the double-buffered streamed blocks under
    the VMEM budget (v7x-safe)."""
    def fits(tt):
        return tt * bytes_per_col <= budget

    if T <= max_tile and fits(T):
        return T
    if T % 128 == 0:
        tt = min((max_tile // 128) * 128, T)
        while tt >= 128:
            if T % tt == 0 and tt >= pad and fits(tt):
                return tt
            tt -= 128
    # TODO(synk): masked remainder tile instead of this full-T fallback.
    return T


def modulated_causal_conv1d(x, c, params, *, kernel_size=5, dilation=1,
                            time_tile=None, mxu_dtype=None,
                            interp_dtype=jnp.bfloat16, max_tile=2048):
    B, C_in, T = x.shape
    Bc, C_cond, Tc = c.shape
    C_out, C_in_w, K = params["w_conv"].shape
    assert Bc == B and C_in_w == C_in and K == kernel_size
    pad = (kernel_size - 1) * dilation
    out_dtype = x.dtype

    conv_dtype = jnp.dtype(mxu_dtype) if mxu_dtype is not None else jnp.dtype(jnp.float32)
    interp_dtype = jnp.dtype(interp_dtype)

    # Streamed bytes per time column (double-buffered x, m, out blocks).
    m_bytes = interp_dtype.itemsize
    bytes_per_col = 2 * (C_in * jnp.dtype(x.dtype).itemsize
                         + Tc * m_bytes
                         + C_out * jnp.dtype(out_dtype).itemsize)

    if time_tile is None:
        time_tile = _choose_time_tile(T, pad, bytes_per_col, max_tile=max_tile)
    else:
        ok = (time_tile == T) or (
            T % time_tile == 0 and time_tile % 128 == 0 and time_tile >= pad)
        if not ok:
            raise ValueError(f"invalid time_tile={time_tile} for T={T}, pad={pad}")
    tT = time_tile
    nT = T // tT

    # Interp matrix: cached host-side constant, shipped narrow (bf16 default);
    # the matmul still accumulates in f32.
    m = jnp.asarray(_interp_matrix_np(Tc, T), dtype=interp_dtype)

    # Fuse scale/shift 1x1 convs; fold their biases via a ones row appended to c.
    w_sf = jnp.concatenate([params["w_scale"], params["w_shift"]], axis=0)      # (2C_in, C_cond)
    b_sf = jnp.concatenate([params["b_scale"], params["b_shift"]], axis=0)      # (2C_in, 1)
    w_sf = jnp.concatenate([w_sf, b_sf], axis=1).astype(jnp.float32)            # (2C_in, C_cond+1)
    c_aug = jnp.concatenate(
        [c.astype(jnp.float32), jnp.ones((B, 1, Tc), jnp.float32)], axis=1)     # (B, C_cond+1, Tc)

    # Flatten causal-conv weight tap-major: w_flat[:, k*C_in + i] == w_conv[:, i, k].
    w_conv_flat = jnp.transpose(params["w_conv"], (0, 2, 1)).reshape(
        C_out, K * C_in).astype(conv_dtype)
    b_conv = params["b_conv"].astype(jnp.float32)                               # (C_out, 1)

    kernel = functools.partial(
        _mcc1d_kernel, c_in=C_in, kernel_size=K, dilation=dilation)

    # VMEM estimate: double-buffered blocks + constants + persistent scratch.
    x_blk = C_in * tT * jnp.dtype(x.dtype).itemsize
    c_blk = (C_cond + 1) * Tc * 4
    m_blk = Tc * tT * m_bytes
    o_blk = C_out * tT * jnp.dtype(out_dtype).itemsize
    const = (2 * C_in * (C_cond + 1)) * 4 + C_out * K * C_in * conv_dtype.itemsize + C_out * 4
    scratch = B * 2 * C_in * Tc * 4 + B * C_in * max(pad, 1) * 4
    est = 2 * (x_blk + c_blk + m_blk + o_blk) + 2 * const + scratch
    # Always set explicitly (v5e's default scoped budget is only 16 MiB) and cap
    # well below v7x's 64 MiB physical VMEM to leave Mosaic internal headroom.
    vmem_limit = int(min(max(est + (8 << 20), 16 << 20), 48 << 20))

    # Grid: time OUTER, batch INNER — the (Tc, tT) interp tile is fetched once
    # per time tile and reused across all B batch elements.
    grid = (nT, B)
    return pl.pallas_call(
        kernel,
        out_shape=jax.ShapeDtypeStruct((B, C_out, T), out_dtype),
        grid_spec=pltpu.PrefetchScalarGridSpec(
            num_scalar_prefetch=0,
            grid=grid,
            in_specs=[
                pl.BlockSpec((1, C_in, tT), lambda t, b: (b, 0, t)),          # x tile
                pl.BlockSpec((1, C_cond + 1, Tc), lambda t, b: (b, 0, 0)),    # c (+ ones row)
                pl.BlockSpec((Tc, tT), lambda t, b: (0, t)),                  # interp slice
                pl.BlockSpec((2 * C_in, C_cond + 1), lambda t, b: (0, 0)),    # fused w_scale/shift
                pl.BlockSpec((C_out, K * C_in), lambda t, b: (0, 0)),         # flattened w_conv
                pl.BlockSpec((C_out, 1), lambda t, b: (0, 0)),                # conv bias
            ],
            out_specs=pl.BlockSpec((1, C_out, tT), lambda t, b: (b, 0, t)),
            scratch_shapes=[
                pltpu.VMEM((B, 2 * C_in, Tc), jnp.float32),                   # hoisted pre
                pltpu.VMEM((B, C_in, max(pad, 1)), jnp.float32),              # causal halo
            ],
        ),
        compiler_params=pltpu.CompilerParams(
            # Both axes "arbitrary": the halo / hoisted-pre scratch carries state
            # across grid steps (measured parallel-vs-arbitrary delta is ~0).
            dimension_semantics=("arbitrary", "arbitrary"),
            vmem_limit_bytes=vmem_limit,
        ),
    )(x, c_aug, m, w_sf, w_conv_flat, b_conv)


def _reference(x, c, params, *, kernel_size=5, dilation=1):
    """Pure-JAX reference mirroring the PyTorch forward (f32, highest precision)."""
    hp = jax.lax.Precision.HIGHEST
    x = x.astype(jnp.float32)
    c = c.astype(jnp.float32)
    scale = jnp.einsum("oc,bct->bot", params["w_scale"], c, precision=hp) + params["b_scale"][None]
    shift = jnp.einsum("oc,bct->bot", params["w_shift"], c, precision=hp) + params["b_shift"][None]
    m = jnp.asarray(_interp_matrix_np(c.shape[2], x.shape[2]))
    scale = jnp.einsum("bct,ts->bcs", scale, m, precision=hp)
    shift = jnp.einsum("bct,ts->bcs", shift, m, precision=hp)
    xm = x * scale + shift
    pad = (kernel_size - 1) * dilation
    xp = jnp.pad(xm, ((0, 0), (0, 0), (pad, 0)))
    T = x.shape[2]
    out = jnp.zeros((x.shape[0], params["w_conv"].shape[0], T), jnp.float32)
    for k in range(kernel_size):
        out = out + jnp.einsum(
            "oi,bit->bot", params["w_conv"][:, :, k],
            xp[:, :, k * dilation: k * dilation + T], precision=hp)
    return out + params["b_conv"][None]


if __name__ == "__main__":
    # Small, deterministic shapes consistent with the module; T chosen so the
    # multi-tile (halo-carry + hoisted-pre reuse) path is exercised at tT=128.
    B, C_in, C_out, C_cond = 2, 8, 16, 6
    T, Tc = 384, 96
    K, dilation = 5, 2

    key = jax.random.PRNGKey(0)
    ks = jax.random.split(key, 8)
    params = {
        "w_scale": 0.1 * jax.random.normal(ks[0], (C_in, C_cond), jnp.float32),
        "b_scale": 0.1 * jax.random.normal(ks[1], (C_in, 1), jnp.float32),
        "w_shift": 0.1 * jax.random.normal(ks[2], (C_in, C_cond), jnp.float32),
        "b_shift": 0.1 * jax.random.normal(ks[3], (C_in, 1), jnp.float32),
        "w_conv": 0.1 * jax.random.normal(ks[4], (C_out, C_in, K), jnp.float32),
        "b_conv": 0.1 * jax.random.normal(ks[5], (C_out, 1), jnp.float32),
    }
    x = jax.random.normal(ks[6], (B, C_in, T), jnp.float32)
    c = jax.random.normal(ks[7], (B, C_cond, Tc), jnp.float32)

    ref = _reference(x, c, params, kernel_size=K, dilation=dilation)

    # 1) Strict structural check: f32 MXU operands, f32 interp matrix, 128-wide
    #    time tiles (3 tiles -> halo carry + per-batch hoisted pre reuse).
    out = modulated_causal_conv1d(x, c, params, kernel_size=K, dilation=dilation,
                                  time_tile=128, interp_dtype=jnp.float32)
    out = jax.block_until_ready(out)
    assert out.shape == (B, C_out, T)
    assert jnp.allclose(out, ref, atol=1e-3, rtol=1e-3), "f32 tiled kernel mismatch"

    # 2) Default path: bf16 interp matrix (halved m traffic), tiled.
    out_bf16m = jax.block_until_ready(
        modulated_causal_conv1d(x, c, params, kernel_size=K, dilation=dilation,
                                time_tile=128))
    assert jnp.allclose(out_bf16m, ref, atol=1e-2, rtol=1e-2), "bf16-interp kernel mismatch"

    # 3) Automatic tile choice (single full-T tile at this size).
    out_full = jax.block_until_ready(
        modulated_causal_conv1d(x, c, params, kernel_size=K, dilation=dilation))
    assert jnp.allclose(out_full, ref, atol=1e-2, rtol=1e-2), "full-T kernel mismatch"

    # 4) bf16 MXU operands for the conv matmul, f32 accumulation (x stays f32).
    out_bf16 = jax.block_until_ready(
        modulated_causal_conv1d(x, c, params, kernel_size=K, dilation=dilation,
                                time_tile=128, mxu_dtype=jnp.bfloat16))
    assert jnp.allclose(out_bf16, ref, atol=1e-1, rtol=1e-1), "bf16 MXU kernel mismatch"

    print("KERNEL_OK")
</pallas_src>

<mosaic_0001>
module attributes {stable_mosaic.version = 11 : i64} {
  func.func @_mcc1d_kernel(%arg0: i32, %arg1: i32, %arg2: memref<1x8x128xf32, #tpu.memory_space<vmem>>, %arg3: memref<1x7x96xf32, #tpu.memory_space<vmem>>, %arg4: memref<96x128xf32, #tpu.memory_space<vmem>>, %arg5: memref<16x7xf32, #tpu.memory_space<vmem>>, %arg6: memref<16x40xf32, #tpu.memory_space<vmem>>, %arg7: memref<16x1xf32, #tpu.memory_space<vmem>>, %arg8: memref<1x16x128xf32, #tpu.memory_space<vmem>>, %arg9: memref<2x16x96xf32, #tpu.memory_space<vmem>>, %arg10: memref<2x8x8xf32, #tpu.memory_space<vmem>>) attributes {dimension_semantics = [#tpu.dimension_semantics<arbitrary>, #tpu.dimension_semantics<arbitrary>], iteration_bounds = array<i64: 3, 2>, scalar_prefetch = 0 : i64, scratch_operands = 2 : i64, tpu.core_type = #tpu.core_type<tc>, window_params = [{transform_indices = @transform_0, window_bounds = array<i64: 1, 8, 128>}, {transform_indices = @transform_1, window_bounds = array<i64: 1, 7, 96>}, {transform_indices = @transform_2, window_bounds = array<i64: 96, 128>}, {pipeline_mode = #tpu.pipeline_mode<synchronous>, transform_indices = @transform_3, window_bounds = array<i64: 16, 7>}, {pipeline_mode = #tpu.pipeline_mode<synchronous>, transform_indices = @transform_4, window_bounds = array<i64: 16, 40>}, {pipeline_mode = #tpu.pipeline_mode<synchronous>, transform_indices = @transform_5, window_bounds = array<i64: 16, 1>}, {transform_indices = @transform_6, window_bounds = array<i64: 1, 16, 128>}]} {
    %c0 = arith.constant 0 : index
    %c0_0 = arith.constant 0 : index
    %c0_1 = arith.constant 0 : index
    %0 = vector.load %arg2[%c0, %c0_0, %c0_1] : memref<1x8x128xf32, #tpu.memory_space<vmem>>, vector<1x8x128xf32>
    %1 = vector.shape_cast %0 : vector<1x8x128xf32> to vector<8x128xf32>
    %c0_i32 = arith.constant 0 : i32
    %2 = arith.cmpi eq, %arg0, %c0_i32 : i32
    %3 = arith.extui %2 : i1 to i32
    %c0_i32_2 = arith.constant 0 : i32
    %4 = arith.cmpi ne, %3, %c0_i32_2 : i32
    scf.if %4 {
      %c0_19 = arith.constant 0 : index
      %c0_20 = arith.constant 0 : index
      %37 = vector.load %arg5[%c0_19, %c0_20] : memref<16x7xf32, #tpu.memory_space<vmem>>, vector<16x7xf32>
      %c0_21 = arith.constant 0 : index
      %c0_22 = arith.constant 0 : index
      %c0_23 = arith.constant 0 : index
      %38 = vector.load %arg3[%c0_21, %c0_22, %c0_23] : memref<1x7x96xf32, #tpu.memory_space<vmem>>, vector<1x7x96xf32>
      %39 = vector.shape_cast %38 : vector<1x7x96xf32> to vector<7x96xf32>
      %cst_24 = arith.constant dense<0.000000e+00> : vector<16x96xf32>
      %40 = tpu.matmul %37, %39, %cst_24 {dimension_numbers = #tpu.dot_dimension_numbers<[1], [0], [0], [1], [0, 0, 1, 1], [], []>} : vector<16x7xf32>, vector<7x96xf32>, vector<16x96xf32> -> vector<16x96xf32>
      %41 = arith.index_cast %arg1 : i32 to index
      %c0_25 = arith.constant 0 : index
      %c0_26 = arith.constant 0 : index
      %42 = vector.load %arg9[%41, %c0_25, %c0_26] : memref<2x16x96xf32, #tpu.memory_space<vmem>>, vector<1x16x96xf32>
      %43 = vector.shape_cast %42 : vector<1x16x96xf32> to vector<16x96xf32>
      %44 = vector.shape_cast %40 : vector<16x96xf32> to vector<1x16x96xf32>
      tpu.vector_store %arg9[%41, %c0_25, %c0_26], %44 {strides = array<i32>} : memref<2x16x96xf32, #tpu.memory_space<vmem>>, vector<1x16x96xf32>,
      %cst_27 = arith.constant 0.000000e+00 : f32
      %45 = vector.broadcast %cst_27 : f32 to vector<8x8xf32>
      %46 = arith.index_cast %arg1 : i32 to index
      %c0_28 = arith.constant 0 : index
      %c0_29 = arith.constant 0 : index
      %47 = vector.load %arg10[%46, %c0_28, %c0_29] : memref<2x8x8xf32, #tpu.memory_space<vmem>>, vector<1x8x8xf32>
      %48 = vector.shape_cast %47 : vector<1x8x8xf32> to vector<8x8xf32>
      %49 = vector.shape_cast %45 : vector<8x8xf32> to vector<1x8x8xf32>
      tpu.vector_store %arg10[%46, %c0_28, %c0_29], %49 {strides = array<i32>} : memref<2x8x8xf32, #tpu.memory_space<vmem>>, vector<1x8x8xf32>,
    } else {
    }
    %5 = arith.index_cast %arg1 : i32 to index
    %c0_3 = arith.constant 0 : index
    %c0_4 = arith.constant 0 : index
    %6 = vector.load %arg9[%5, %c0_3, %c0_4] : memref<2x16x96xf32, #tpu.memory_space<vmem>>, vector<1x16x96xf32>
    %7 = vector.shape_cast %6 : vector<1x16x96xf32> to vector<16x96xf32>
    %c0_5 = arith.constant 0 : index
    %c0_6 = arith.constant 0 : index
    %8 = vector.load %arg4[%c0_5, %c0_6] : memref<96x128xf32, #tpu.memory_space<vmem>>, vector<96x128xf32>
    %cst = arith.constant dense<0.000000e+00> : vector<16x128xf32>
    %9 = tpu.matmul %7, %8, %cst {dimension_numbers = #tpu.dot_dimension_numbers<[1], [0], [0], [1], [0, 0, 1, 1], [], []>} : vector<16x96xf32>, vector<96x128xf32>, vector<16x128xf32> -> vector<16x128xf32>
    %10 = vector.extract_strided_slice %9 {offsets = [0, 0], sizes = [8, 128], strides = [1, 1]} : vector<16x128xf32> to vector<8x128xf32>
    %11 = vector.extract_strided_slice %9 {offsets = [8, 0], sizes = [8, 128], strides = [1, 1]} : vector<16x128xf32> to vector<8x128xf32>
    %12 = arith.mulf %1, %10 : vector<8x128xf32>
    %13 = arith.addf %12, %11 : vector<8x128xf32>
    %14 = arith.index_cast %arg1 : i32 to index
    %c0_7 = arith.constant 0 : index
    %c0_8 = arith.constant 0 : index
    %15 = vector.load %arg10[%14, %c0_7, %c0_8] : memref<2x8x8xf32, #tpu.memory_space<vmem>>, vector<1x8x8xf32>
    %16 = vector.shape_cast %15 : vector<1x8x8xf32> to vector<8x8xf32>
    %17 = tpu.concatenate %16, %13 in 1 : vector<8x8xf32>, vector<8x128xf32> -> vector<8x136xf32>
    %18 = vector.extract_strided_slice %13 {offsets = [0, 120], sizes = [8, 8], strides = [1, 1]} : vector<8x128xf32> to vector<8x8xf32>
    %19 = arith.index_cast %arg1 : i32 to index
    %c0_9 = arith.constant 0 : index
    %c0_10 = arith.constant 0 : index
    %20 = vector.load %arg10[%19, %c0_9, %c0_10] : memref<2x8x8xf32, #tpu.memory_space<vmem>>, vector<1x8x8xf32>
    %21 = vector.shape_cast %20 : vector<1x8x8xf32> to vector<8x8xf32>
    %22 = vector.shape_cast %18 : vector<8x8xf32> to vector<1x8x8xf32>
    tpu.vector_store %arg10[%19, %c0_9, %c0_10], %22 {strides = array<i32>} : memref<2x8x8xf32, #tpu.memory_space<vmem>>, vector<1x8x8xf32>,
    %23 = vector.extract_strided_slice %17 {offsets = [0, 0], sizes = [8, 128], strides = [1, 1]} : vector<8x136xf32> to vector<8x128xf32>
    %24 = vector.extract_strided_slice %17 {offsets = [0, 2], sizes = [8, 128], strides = [1, 1]} : vector<8x136xf32> to vector<8x128xf32>
    %25 = vector.extract_strided_slice %17 {offsets = [0, 4], sizes = [8, 128], strides = [1, 1]} : vector<8x136xf32> to vector<8x128xf32>
    %26 = vector.extract_strided_slice %17 {offsets = [0, 6], sizes = [8, 128], strides = [1, 1]} : vector<8x136xf32> to vector<8x128xf32>
    %27 = vector.extract_strided_slice %17 {offsets = [0, 8], sizes = [8, 128], strides = [1, 1]} : vector<8x136xf32> to vector<8x128xf32>
    %28 = tpu.concatenate %23, %24, %25, %26, %27 in 0 : vector<8x128xf32>, vector<8x128xf32>, vector<8x128xf32>, vector<8x128xf32>, vector<8x128xf32> -> vector<40x128xf32>
    %c0_11 = arith.constant 0 : index
    %c0_12 = arith.constant 0 : index
    %29 = vector.load %arg6[%c0_11, %c0_12] : memref<16x40xf32, #tpu.memory_space<vmem>>, vector<16x40xf32>
    %cst_13 = arith.constant dense<0.000000e+00> : vector<16x128xf32>
    %30 = tpu.matmul %29, %28, %cst_13 {dimension_numbers = #tpu.dot_dimension_numbers<[1], [0], [0], [1], [0, 0, 1, 1], [], []>} : vector<16x40xf32>, vector<40x128xf32>, vector<16x128xf32> -> vector<16x128xf32>
    %c0_14 = arith.constant 0 : index
    %c0_15 = arith.constant 0 : index
    %31 = vector.load %arg7[%c0_14, %c0_15] : memref<16x1xf32, #tpu.memory_space<vmem>>, vector<16x1xf32>
    %32 = vector.broadcast %31 : vector<16x1xf32> to vector<16x128xf32>
    %33 = arith.addf %30, %32 : vector<16x128xf32>
    %c0_16 = arith.constant 0 : index
    %c0_17 = arith.constant 0 : index
    %c0_18 = arith.constant 0 : index
    %34 = vector.load %arg8[%c0_16, %c0_17, %c0_18] : memref<1x16x128xf32, #tpu.memory_space<vmem>>, vector<1x16x128xf32>
    %35 = vector.shape_cast %34 : vector<1x16x128xf32> to vector<16x128xf32>
    %36 = vector.shape_cast %33 : vector<16x128xf32> to vector<1x16x128xf32>
    tpu.vector_store %arg8[%c0_16, %c0_17, %c0_18], %36 {strides = array<i32>} : memref<1x16x128xf32, #tpu.memory_space<vmem>>, vector<1x16x128xf32>,
    return
  }
  func.func @transform_0(%arg0: i32, %arg1: i32) -> (i32, i32, i32) {
    %c0_i32 = arith.constant 0 : i32
    %c0_i32_0 = arith.constant 0 : i32
    return %arg1, %c0_i32, %arg0 : i32, i32, i32
  }
  func.func @transform_1(%arg0: i32, %arg1: i32) -> (i32, i32, i32) {
    %c0_i32 = arith.constant 0 : i32
    %c0_i32_0 = arith.constant 0 : i32
    %c0_i32_1 = arith.constant 0 : i32
    return %arg1, %c0_i32, %c0_i32_0 : i32, i32, i32
  }
  func.func @transform_2(%arg0: i32, %arg1: i32) -> (i32, i32) {
    %c0_i32 = arith.constant 0 : i32
    %c0_i32_0 = arith.constant 0 : i32
    return %c0_i32, %arg0 : i32, i32
  }
  func.func @transform_3(%arg0: i32, %arg1: i32) -> (i32, i32) {
    %c0_i32 = arith.constant 0 : i32
    %c0_i32_0 = arith.constant 0 : i32
    %c0_i32_1 = arith.constant 0 : i32
    return %c0_i32, %c0_i32_0 : i32, i32
  }
  func.func @transform_4(%arg0: i32, %arg1: i32) -> (i32, i32) {
    %c0_i32 = arith.constant 0 : i32
    %c0_i32_0 = arith.constant 0 : i32
    %c0_i32_1 = arith.constant 0 : i32
    return %c0_i32, %c0_i32_0 : i32, i32
  }
  func.func @transform_5(%arg0: i32, %arg1: i32) -> (i32, i32) {
    %c0_i32 = arith.constant 0 : i32
    %c0_i32_0 = arith.constant 0 : i32
    %c0_i32_1 = arith.constant 0 : i32
    return %c0_i32, %c0_i32_0 : i32, i32
  }
  func.func @transform_6(%arg0: i32, %arg1: i32) -> (i32, i32, i32) {
    %c0_i32 = arith.constant 0 : i32
    %c0_i32_0 = arith.constant 0 : i32
    return %arg1, %c0_i32, %arg0 : i32, i32, i32
  }
}

</mosaic_0001>

<bundles_post_ra>
// kernel: tpu_custom_call.1
= control target key start
LH: loop header
LB: loop body
LE: loop exit
PB: predicated region body
PF: predicated region fallthrough
CT: control target
= control target key end

     0   :  { %s1479_s0 = inlined_call_operand.vmem [shape: f32[2,8,384], index: 0, kind: input, shape index: {}]   ;;  %s1480_s1 = inlined_call_operand.vmem [shape: f32[2,7,96], index: 1, kind: input, shape index: {}]   ;;  %s1481_s2 = inlined_call_operand.hbm [shape: f32[96,384], index: 2, kind: input, shape index: {}]   ;;  %s1482_s3 = inlined_call_operand.vmem [shape: f32[16,7], index: 3, kind: input, shape index: {}]   ;;  %s1483_s4 = inlined_call_operand.vmem [shape: f32[16,40], index: 4, kind: input, shape index: {}]   ;;  %s1484_s5 = inlined_call_operand.vmem [shape: f32[16,1], index: 5, kind: input, shape index: {}]   ;;  %s1485_s6 = inlined_call_operand.hbm [shape: f32[2,16,384], index: 6, kind: output, shape index: {}]  }
   0x1   :  { %1491 = sst [smem:[#allocation17_spill]] %s1481_s2 }
   0x2   :  { %11 = vsyncpa [#allocation5], 0 }
   0x3   :  { %13 = vsyncpa [#allocation5 + $0x1], 0 }
   0x4   :  { %14 = vsyncpa [#allocation6], 0 }
   0x5   :  { %16 = vsyncpa [#allocation6 + $0x1], 0  ;;  %s1223_s21 = smov 0   ;;  %s1225_s22 = smov 0  }
   0x6   :  { %s1227_s23 = smov 0   ;;  %s1229_s24 = smov 0  }
   0x7   :  { %s1231_s25 = smov 0   ;;  %s1233_s26 = smov 0  }
   0x8   :  { %s1235_s27 = smov 0   ;;  %s1237_s28 = smov 0  }
   0x9   :  { %s1239_s29 = smov 0   ;;  %s1241_s30 = smov 0  }
   0xa   :  { %s1243_s7 = smov 0  }
   0xb LB: > { %1492 = sst [smem:[#allocation10_spill]] %s1152_s26  ;;  %s810_s8 = sadd.s32 4294967295, %s1172_s7   ;;  %s1172_s7 = sphi %s1243_s7, %s22_s7   ;;  %s1168_s30 = sphi %s1241_s30, %s1511_s30   ;;  %s1164_s29 = sphi %s1239_s29, %s1510_s29   ;;  %s1160_s28 = sphi %s1237_s28, %s1509_s28   ;;  %s1156_s27 = sphi %s1235_s27, %s1508_s27   ;;  %s1152_s26 = sphi %s1233_s26, %s1507_s26   ;;  %s1148_s25 = sphi %s1231_s25, %s1516_s25   ;;  %s1144_s24 = sphi %s1229_s24, %s1515_s24   ;;  %s1140_s23 = sphi %s1227_s23, %s1514_s23   ;;  %s1136_s22 = sphi %s1225_s22, %s1513_s22   ;;  %s1132_s21 = sphi %s1223_s21, %s1512_s21  }
   0xc   : > { %1493 = sst [smem:[#allocation11_spill]] %s1164_s29  ;;  %s811_s9 = sadd.s32 4294967294, %s1172_s7  }
   0xd   : > { %1494 = sst [smem:[#allocation12_spill]] %s1168_s30  ;;  %s31_s10 = sadd.s32 1, %s1164_s29 }
   0xe   : > { %s34_s11 = sadd.s32 1, %s1168_s30  ;;  %p32_p0 = scmp.ge.s32.totalorder %s31_s10, 2 }
   0xf   : > { %s95_s12 = sadd.s32 1, %s1152_s26  ;;  %p102_p1 = scmp.ne.s32.totalorder %s1152_s26, %s1148_s25 }
  0x10   : > { %p103_p2 = scmp.eq.s32.totalorder %s1172_s7, 0  ;;  %s1518_s10 = smov (%p32_p0, %s31_s10), 0 }
  0x11   : > { %1495 = sst [smem:[#allocation13_spill]] %s1518_s10  ;;  %s1520_s11 = smov (!%p32_p0, %s34_s11), %s1168_s30 }
  0x12   : > { %p1287_p3 = por %p103_p2, %p102_p1  ;;  %p108_p4 = scmp.ne.s32.totalorder %s1148_s25, %s1144_s24 }
  0x13   : > { %p36_p5 = scmp.ge.s32.totalorder %s1520_s11, 3  ;;  %p109_p6 = scmp.eq.s32.totalorder %s810_s8, 0 }
  0x14   : > { %s181_s14 = ssub.s32 %s1164_s29, %s1518_s10  ;;  %s186_s15 = sadd.s32 1, %s1140_s23 }
  0x15   : > { %s1522_s11 = smov (%p36_p5, %s1520_s11), 0  ;;  %p1297_p7 = por %p109_p6, %p108_p4 }
  0x16   : > { %1497 = sst [smem:[#allocation14_spill]] %s1522_s11  ;;  %p196_p8 = scmp.ne.s32.totalorder %s1140_s23, %s1136_s22 }
  0x17   : > { %s92_s17 = ssub.s32 %s1168_s30, %s1522_s11  ;;  %p197_p9 = scmp.eq.s32.totalorder %s810_s8, 5 }
  0x18   : > { %p93_p10 = scmp.eq.s32.totalorder %s92_s17, 0  ;;  %s183_s18 = sor.u32 %s181_s14, %s92_s17 }
  0x19   : > { %p184_p11 = scmp.eq.s32.totalorder %s183_s18, 0  ;;  %p1305_p12 = por %p197_p9, %p196_p8 }
  0x1a   : > { %s1310_s20 = scalar_select %p93_p10, %s1152_s26, %s95_s12  }
  0x1b   : > { %s1313_s24 = scalar_select %p184_p11, %s1140_s23, %s186_s15  }
  0x1c   : > { %1500 = sst [smem:[#allocation15_spill]] %s1310_s20  ;;  %p202_p13 = scmp.ne.s32.totalorder %s1136_s22, %s1132_s21 }
  0x1d   : > { %1501 = sst [smem:[#allocation16_spill]] %s1313_s24  ;;  %p203_p0 = scmp.eq.s32.totalorder %s811_s9, 5 }
  0x1e   : > { %p920_p1 = scmp.lt.s32.totalorder %s1172_s7, 6  ;;  %s250_s11 = sand.u32 1, %s1152_s26  }
  0x1f   : > { %p1318_p2 = por %p203_p0, %p202_p13  ;;  %s904_s8 = smul.u32 96, %s250_s11 }
  0x20   : > { %s814_s29 = sshll.u32 %s1168_s30, 7  ;;  %p1326_p4 = pnand %p920_p1, %p1287_p3 }
  0x21   : > { %s1504_s2 = sld [smem:[#allocation17_spill]]  ;;  %s254_s18 = scalar_lea.vmem [#allocation4], %s904_s8 }
  0x22   : > { %s260_s9 = sshll.u32 %s254_s18, 4  ;;  %s251_s20 = scalar_lea.sflag [#allocation5], %s250_s11  ;;  %s261_s9 = int_to_ptr.vmem [resolvable:$true] %s260_s9 }
  0x23   : > { %p1026_p5 = pneg %p1326_p4  ;;  %s1037_s24 = scalar_lea.vmem %s261_s9, 1536 }
  0x24   : > { %p1038_p6 = scmp.ne.s32.totalorder %s261_s9, %s1037_s24  ;;  %s1174_s13 = smov [#allocation4]  }
  0x25   : > { %s1042_s30 = sshll.u32 %s1174_s13, 4  ;;  %s1043_s30 = int_to_ptr.vmem [resolvable:$false] %s1042_s30 }
  0x26   : > { %p1040_p8 = pnand %p1038_p6, %p1026_p5  ;;  %s1044_s26 = scalar_lea.vmem %s1043_s30, 3072 }
  0x27   : > { %s259_s15 = scalar_lea.hbm %s1504_s2, %s814_s29  ;;  %p1045_p3 = scmp.lt.s32.totalorder %s261_s9, %s1043_s30 }
  0x28   : > { %p1041_p9 = pneg %p1040_p8  ;;  %p1046_p10 = scmp.lt.s32.totalorder %s1044_s26, %s1037_s24 }
  0x2a   : > { %p1047_p11 = por %p1046_p10, %p1045_p3 }
  0x2c   : > { %p1048_p13 = pnand %p1047_p11, %p1041_p9 }
  0x2e   : > { %1051 = shalt.err (!%p1048_p13)
}
  0x2f   : > { %s1175_s29 = smov 384   ;;  %s1176_s11 = smov 128  }
  0x30   : > { %s1177_s8 = smov 8   ;;  %p815_p0 = scmp.ge.s32.totalorder %s1172_s7, 1 }
  0x31   : > { %915 = dma.hbm_to_vmem [thread:$0]  (!%p1326_p4), %s259_s15, 1536, %s261_s9, %s251_s20, %s1175_s29, %s1176_s11, %s1177_s8  }
  0x32   : > { %p268_p1 = scmp.lt.s32.totalorder %s1172_s7, 7 }
  0x34   : > { %p269_p5 = pnand %p815_p0, %p268_p1 }
  0x35   : > { %s274_s17 = sand.u32 (!%p269_p5), 1, %s1148_s25  }
  0x36   : > { %272 = sbr.rel (%p269_p5) target bundleno = 953 (0x3b9), region = 44  ;;  %s275_s26 = scalar_lea.sflag (!%p269_p5), [#allocation5], %s274_s17 }
  0x37   : > { %s905_s30 = smul.u32 (!%p269_p5), 96, %s274_s17 }
  0x39   : > { %s1340_s24 = scalar_lea.vmem (!%p269_p5), [#allocation4], %s905_s30 }
  0x3b   : > { %1123 = dma.done.wait (%p1297_p7), %s275_s26, 1536  }
  0x3c   : > { %1125 = vsyncadd (%p1297_p7), %s275_s26, 4294965760  ;;  %p319_p4 = scmp.lt.s32.totalorder %s1156_s27, 1  ;;  %p321_p6 = scmp.lt.s32.totalorder %s1160_s28, 2 }
  0x3d   : > { %s316_s20 = sand.u32 1, %s1136_s22   ;;  %p819_p7 = scmp.ne.s32.totalorder %s1160_s28, 0 }
  0x3e   : > { %s320_s14 = scalar_select %p319_p4, %s1156_s27, 1 }
  0x3f   : > { %s322_s12 = scalar_select %p321_p6, %s1160_s28, 2 }
  0x40   : > { %s906_s15 = smul.u32 3, %s320_s14  ;;  %s818_s18 = sshll.u32 %s320_s14, 3 }
  0x41   : > { %s330_s29 = scalar_lea.vmem %s1480_s1, %s818_s18  ;;  %s816_s16 = sshll.u32 %s316_s20, 4 }
  0x42   : > { %s324_s11 = sadd.s32 %s906_s15, %s322_s12  ;;  %s1361_s2 = scalar_lea.vmem [#allocation7], %s816_s16 }
  0x43   : > { %s817_s8 = sshll.u32 %s324_s11, 3  ;;  %335 = sbr.rel (%p819_p7) target bundleno = 271 (0x10f), region = 52 }
  0x44   : > { %s326_s26 = scalar_lea.vmem %s1479_s0, %s817_s8  ;;  %s824_s9 = sshll.u32 (!%p819_p7), %s1156_s27, 3 }
  0x45   : > { %v1359_v0 = vld [vmem:[%s326_s26] sm:$0xff]  ;;  %s431_s13 = scalar_lea.vmem (!%p819_p7), [#allocation3], %s824_s9 }
  0x48   : > { %v338_v1 = vld [vmem:[%s330_s29] sm:$0x7f]  ;;  %vm346_vm0 = vcmask 1046528   ;;  %vm339_vm1 = vcmask 56320   ;;  %v337_v3 = vld [vmem:[%s1482_s3 + $0x8] sm:$0xff]  ;;  %vm432_vm2 = vcmask 64512  }
  0x49   : > { %v336_v2 = vld [vmem:[%s1482_s3] sm:$0xff]  ;;  %859 = vmatprep.subr.msk.mxu0 %vm346_vm0, %v338_v1  ;;  %v1178_v4 = vmov 0.0   ;;  %s823_s29 = sshll.u32 %s1156_s27, 4  ;;  %vm427_vm3 = vcmask 785408  }
  0x4a   : > { %861 = vmatprep.mubr.msk.f32.mxu0 %vm339_vm1, %v336_v2  ;;  %860 = vmatpush3.msk.msra.mxu0 %vm346_vm0, %v338_v1  ;;  %433 = vst.msk [vmem:[%s431_s13] sm:$0xff] %vm432_vm2, %v1178_v4  ;;  %s426_s16 = scalar_lea.vmem [#allocation2], %s823_s29 }
  0x4b   : > { %862 = vmatmul.mubr.msk.f32.vlgmr.msra.gmra.mxu0 %vm339_vm1, %v337_v3 }
 0x10b   : > { %v863_v5 = vpop.f32.mrf.mxu0 }
 0x10c   : > { %429 = vst.msk [vmem:[%s426_s16 + $0x8] sm:$0xff] %vm427_vm3, %v863_v5 }
 0x10d   : > { %v416_v6 = vpop.f32.mrf.mxu0 }
 0x10e   : > { %428 = vst.msk [vmem:[%s426_s16] sm:$0xff] %vm427_vm3, %v416_v6 }
 0x10f PF: > { %v449_v7 = vld [vmem:[%s1340_s24 + $0x58] sm:$0xff]  ;;  %v448_v8 = vld [vmem:[%s1340_s24 + $0x50] sm:$0xff]  ;;  %s825_s11 = sshll.u32 %s1156_s27, 4  ;;  %v447_v9 = vld [vmem:[%s1340_s24 + $0x48] sm:$0xff]  ;;  %vm450_vm4 = vcmask 785408   ;;  %s1179_s17 = smov 8  }
 0x110   : > { %864 = vmatprep.subr.mxu0 %v449_v7  ;;  %v446_v10 = vld [vmem:[%s1340_s24 + $0x40] sm:$0xff]  ;;  %s435_s8 = scalar_lea.vmem [#allocation2], %s825_s11  ;;  %v445_v12 = vld [vmem:[%s1340_s24 + $0x38] sm:$0xff]  ;;  %v444_v13 = vld [vmem:[%s1340_s24 + $0x30] sm:$0xff]  ;;  %s828_s30 = sshll.u32 %s1156_s27, 3  ;;  %vm541_vm5 = vcmask 64512  }
 0x111   : > { %865 = vmatpush3.msra.mxu0 %v449_v7  ;;  %v443_v14 = vld [vmem:[%s1340_s24 + $0x28] sm:$0xff]  ;;  %v442_v15 = vld [vmem:[%s1340_s24 + $0x20] sm:$0xff]  ;;  %v441_v16 = vld [vmem:[%s1340_s24 + $0x18] sm:$0xff]  ;;  %s535_s26 = scalar_lea.vmem [#allocation3], %s828_s30  ;;  %s1181_s14 = smov 120   ;;  %vm587_vm6 = vcmask 326656  }
 0x112   : > { %866 = vmatprep.subr.mxu0 %v448_v8  ;;  %v440_v17 = vld [vmem:[%s1340_s24 + $0x10] sm:$0xff]  ;;  %v439_v18 = vld [vmem:[%s1340_s24 + $0x8] sm:$0xff]  ;;  %v438_v19 = vld [vmem:[%s1340_s24] sm:$0xff]  ;;  %s1180_s24 = smov 122   ;;  %v1182_v29 = vmov 0   ;;  %s1183_s15 = smov 124  }
 0x113   : > { %867 = vmatpush3.msra.mxu0 %v448_v8  ;;  %v536_v25 = vld [vmem:[%s535_s26] sm:$0xff]  ;;  %1023 = vset.pattern.permute.xlu0 %v1182_v29  ;;  %s1184_s9 = smov 126   ;;  %v576_v30 = vld [vmem:[%s1484_s5 + $0x8] sm:$0xff]  ;;  %vm570_vm7 = vcmask 982016   ;;  %vm563_vm8 = vcmask 998400   ;;  %vm556_vm9 = vcmask 1014784  }
 0x114   : > { %868 = vmatprep.subr.mxu0 %v447_v9  ;;  %v573_v27 = vld [vmem:[%s1483_s4] sm:$0xff]  ;;  %1022 = vset.pattern.permute.xlu1 %v1182_v29  ;;  %vm549_vm10 = vcmask 1031168   ;;  %v574_v44 = vld [vmem:[%s1483_s4 + $0x8] sm:$0xff]  ;;  %s686_s18 = sshll.u32 %s1361_s2, 4  ;;  %s1185_s13 = smov [#allocation7]   ;;  %s1412_s18 = int_to_ptr.vmem [resolvable:$true] %s686_s18 }
 0x115   : > { %v436_v11 = vld [vmem:[%s435_s8] sm:$0xff]  ;;  %869 = vmatpush3.msra.mxu0 %v447_v9  ;;  %v437_v20 = vld [vmem:[%s435_s8 + $0x8] sm:$0xff]  ;;  %901 = vmatprep.mubr.msk.f32.mxu1 %vm587_vm6, %v573_v27  ;;  %s1056_s29 = sshll.u32 %s1185_s13, 4  ;;  %s1057_s29 = int_to_ptr.vmem [resolvable:$false] %s1056_s29 }
 0x116   : > { %888 = vmatprep.mubr.msk.f32.mxu0 %vm450_vm4, %v436_v11  ;;  %870 = vmatprep.subr.mxu0 %v446_v10  ;;  %v575_v31 = vld [vmem:[%s1484_s5] sm:$0xff]  ;;  %s1058_s16 = scalar_lea.vmem %s1057_s29, 512  ;;  %p1059_p10 = scmp.lt.s32.totalorder %s1412_s18, %s1057_s29 }
 0x117   : > { %871 = vmatpush3.msra.mxu0 %v446_v10 }
 0x118   : > { %872 = vmatprep.subr.mxu0 %v445_v12 }
 0x119   : > { %873 = vmatpush3.msra.mxu0 %v445_v12 }
 0x11a   : > { %874 = vmatprep.subr.mxu0 %v444_v13 }
 0x11b   : > { %875 = vmatpush3.msra.mxu0 %v444_v13 }
 0x11c   : > { %876 = vmatprep.subr.mxu0 %v443_v14 }
 0x11d   : > { %877 = vmatpush3.msra.mxu0 %v443_v14 }
 0x11e   : > { %878 = vmatprep.subr.mxu0 %v442_v15 }
 0x11f   : > { %879 = vmatpush3.msra.mxu0 %v442_v15 }
 0x120   : > { %880 = vmatprep.subr.mxu0 %v441_v16 }
 0x121   : > { %881 = vmatpush3.msra.mxu0 %v441_v16 }
 0x122   : > { %882 = vmatprep.subr.mxu0 %v440_v17 }
 0x123   : > { %883 = vmatpush3.msra.mxu0 %v440_v17 }
 0x124   : > { %884 = vmatprep.subr.mxu0 %v439_v18 }
 0x125   : > { %885 = vmatpush3.msra.mxu0 %v439_v18 }
 0x126   : > { %886 = vmatprep.subr.mxu0 %v438_v19 }
 0x127   : > { %887 = vmatpush3.msra.mxu0 %v438_v19 }
 0x128   : > { %889 = vmatmul.mubr.msk.f32.vlgmr.msra.gmra.mxu0 %vm450_vm4, %v437_v20 }
 0x1e8   : > { %v890_v21 = vpop.f32.mrf.mxu0 }
 0x1ea   : > { %v523_v22 = vpop.f32.mrf.mxu0 }
 0x1eb   : > { %v532_v23 = vmul.f32 %v523_v22, %v1359_v0 }
 0x1ed   : > { %v533_v24 = vadd.f32 %v890_v21, %v532_v23 }
 0x1ef   : > { %538 = vrot.lane.b32.xlu0 %v533_v24, %s1179_s17 }
 0x261   : > { %v539_v26 = vpop.permute.xlu0 %538 }
 0x262   : > { %561 = vrot.lane.b32.xlu0 %v539_v26, %s1180_s24  ;;  %568 = vrot.lane.b32.xlu1 %v539_v26, %s1181_s14  ;;  %543 = vst.msk [vmem:[%s535_s26] sm:$0xff] %vm541_vm5, %v539_v26  ;;  %v542_v28 = vsel %vm541_vm5, %v536_v25, %v539_v26  ;;  %s907_s26 = smul.u32 6, %s1156_s27  ;;  %s1418_s27 = scalar_lea.sflag [#allocation6], %s316_s20 }
 0x266   : > { %566 = vrot.lane.b32.xlu0 %v542_v28, %s1181_s14  ;;  %559 = vrot.lane.b32.xlu1 %v542_v28, %s1180_s24  ;;  %s683_s24 = sadd.s32 %s1160_s28, %s907_s26  ;;  %s1052_s28 = scalar_lea.vmem %s1412_s18, 256 }
 0x267   : > { %s832_s14 = sshll.u32 %s683_s24, 7  ;;  %p1053_p8 = scmp.ne.s32.totalorder %s1412_s18, %s1052_s28 }
 0x268   : > { %p1060_p11 = scmp.lt.s32.totalorder %s1058_s16, %s1052_s28 }
 0x269   : > { %p1054_p9 = pnand %p1053_p8, %p1305_p12 }
 0x26a   : > { %554 = vrot.lane.b32.xlu0 %v539_v26, %s1183_s15  ;;  %552 = vrot.lane.b32.xlu1 %v542_v28, %s1183_s15  ;;  %p1061_p13 = por %p1060_p11, %p1059_p10 }
 0x26b   : > { %p1055_p3 = pneg %p1054_p9 }
 0x26d   : > { %p1062_p0 = pnand %p1061_p13, %p1055_p3 }
 0x26e   : > { %547 = vrot.lane.b32.xlu0 %v539_v26, %s1184_s9  ;;  %545 = vrot.lane.b32.xlu1 %v542_v28, %s1184_s9  ;;  %s1410_s9 = scalar_lea.hbm %s1485_s6, %s832_s14 }
 0x272   : > { %584 = vperm.xlu0 %1023, %v576_v30   ;;  %579 = vperm.xlu1 %1022, %v575_v31  }
 0x2d4   : > { %v562_v32 = vpop.permute.xlu0 %561  ;;  %v569_v33 = vpop.permute.xlu1 %568 }
 0x2d8   : > { %v567_v34 = vpop.permute.xlu0 %566  ;;  %v560_v35 = vpop.permute.xlu1 %559 }
 0x2d9   : > { %v571_v36 = vsel %vm570_vm7, %v567_v34, %v569_v33  ;;  %v564_v37 = vsel %vm563_vm8, %v560_v35, %v562_v32 }
 0x2da   : > { %891 = vmatprep.subr.mxu1 %v571_v36 }
 0x2db   : > { %892 = vmatpush3.msra.mxu1 %v571_v36 }
 0x2dc   : > { %v555_v38 = vpop.permute.xlu0 %554  ;;  %893 = vmatprep.subr.mxu1 %v564_v37  ;;  %v553_v39 = vpop.permute.xlu1 %552 }
 0x2dd   : > { %894 = vmatpush3.msra.mxu1 %v564_v37  ;;  %v557_v40 = vsel %vm556_vm9, %v553_v39, %v555_v38 }
 0x2de   : > { %895 = vmatprep.subr.mxu1 %v557_v40 }
 0x2df   : > { %896 = vmatpush3.msra.mxu1 %v557_v40 }
 0x2e0   : > { %v548_v41 = vpop.permute.xlu0 %547  ;;  %v546_v42 = vpop.permute.xlu1 %545 }
 0x2e1   : > { %v550_v43 = vsel %vm549_vm10, %v546_v42, %v548_v41 }
 0x2e2   : > { %897 = vmatprep.subr.mxu1 %v550_v43 }
 0x2e3   : > { %898 = vmatpush3.msra.mxu1 %v550_v43 }
 0x2e4   : > { %899 = vmatprep.subr.mxu1 %v542_v28 }
 0x2e5   : > { %900 = vmatpush3.msra.mxu1 %v542_v28 }
 0x2e6   : > { %902 = vmatmul.mubr.msk.f32.vlgmr.msra.gmra.mxu1 %vm587_vm6, %v574_v44 }
 0x2ed   : > { %v585_v45 = vpop.permute.xlu0 %584  ;;  %v580_v47 = vpop.permute.xlu1 %579 }
 0x3a6   : > { %v903_v46 = vpop.f32.mrf.mxu1 }
 0x3a7   : > { %v666_v48 = vadd.f32 %v903_v46, %v585_v45 }
 0x3a8   : > { %v660_v49 = vpop.f32.mrf.mxu1 }
 0x3a9   : > { %670 = vst [vmem:[%s1361_s2 + $0x8] sm:$0xff] %v666_v48  ;;  %v661_v50 = vadd.f32 %v660_v49, %v580_v47 }
 0x3ab   : > { %669 = vst [vmem:[%s1361_s2] sm:$0xff] %v661_v50 }
 0x3ac   : > { %1065 = shalt.err (!%p1062_p0)
}
 0x3ad   : > { %s1066_s2 = scalar_lea.hbm %s1410_s9, 256  ;;  %s1070_s8 = scalar_lea.hbm %s1485_s6, 1536 }
 0x3ae   : > { %p1067_p1 = scmp.ne.s32.totalorder %s1410_s9, %s1066_s2  ;;  %p1071_p6 = scmp.lt.s32.totalorder %s1410_s9, %s1485_s6 }
 0x3af   : > { %p1072_p7 = scmp.lt.s32.totalorder %s1070_s8, %s1066_s2 }
 0x3b0   : > { %p1068_p5 = pnand %p1067_p1, %p1305_p12 }
 0x3b1   : > { %p1073_p8 = por %p1072_p7, %p1071_p6 }
 0x3b2   : > { %p1069_p4 = pneg %p1068_p5 }
 0x3b4   : > { %p1074_p9 = pnand %p1073_p8, %p1069_p4 }
 0x3b6   : > { %1077 = shalt.err (!%p1074_p9)
}
 0x3b7   : > { %s1186_s24 = smov 128   ;;  %s1187_s14 = smov 384  }
 0x3b8   : > { %910 = dma.vmem_to_hbm [thread:$0]  (%p1305_p12), %s1412_s18, 256, %s1410_s9, %s1418_s27, %s1186_s24, %s1187_s14, %s1179_s17  }
 0x3b9 PF: > { %p921_p3 = scmp.ge.s32.totalorder %s1172_s7, 2  ;;  %s701_s12 = sand.u32 1, %s1132_s21  }
 0x3ba   : > { %s702_s15 = scalar_lea.sflag [#allocation6], %s701_s12 }
 0x3bb   : > { %p917_p10 = pnand %p921_p3, %p1318_p2 }
 0x3bd   : > { %p918_p11 = pneg %p917_p10 }
 0x3bf   : > { %1127 = dma.done.wait (%p918_p11), %s702_s15, 256  }
 0x3c0   : > { %1129 = vsyncadd (%p918_p11), %s702_s15, 4294967040  ;;  %s22_s7 = sadd.s32 1, %s1172_s7   ;;  %s1505_s19 = sld [smem:[#allocation16_spill]] }
 0x3c1   : > { %p19_p13 = scmp.ge.s32.totalorder %s22_s7, 8   ;;  %s1506_s17 = sld [smem:[#allocation10_spill]] }
 0x3c2   : > { %s1507_s26 = sld [smem:[#allocation15_spill]]  ;;  %s1512_s21 = smov %s1136_s22 }
 0x3c3   : > { %s1508_s27 = sld [smem:[#allocation11_spill]]  ;;  %s1513_s22 = smov %s1140_s23 }
 0x3c4   : > { %s1509_s28 = sld [smem:[#allocation12_spill]]  ;;  %s1515_s24 = smov %s1148_s25 }
 0x3c5   : > { %s1510_s29 = sld [smem:[#allocation13_spill]]  ;;  %21 = sbr.rel (!%p19_p13) target bundleno = 11 (0xb), region = 103 }
 0x3c6   : > { %s1511_s30 = sld [smem:[#allocation14_spill]]  ;;  %s1514_s23 = smov %s1505_s19 }
 0x3c7   : > { %s1516_s25 = smov %s1506_s17 }
 0x3ca   :  { %707 = vsyncpa [#allocation5], 1 }
 0x3cb   :  { %709 = vsyncpa [#allocation5 + $0x1], 1 }
 0x3cc   :  { %710 = vsyncpa [#allocation6], 1 }
 0x3cd   :  { %712 = vsyncpa [#allocation6 + $0x1], 1 }

</bundles_post_ra>
